<compile_context>
chip_gen: v5e
topology: v5e:2x2
jax: 0.10.0
libtpu: 0.0.40
codegen_flags: <defaults>
</compile_context>

<pallas_src>
import numpy as np
import jax
import jax.numpy as jnp
from jax.experimental import pallas as pl
from jax.experimental.pallas import tpu as pltpu

_TILE = 256                       # TJ = TI = 256 (multiple of (8,128) tiling, review's range)
_I32_MAX = int(np.iinfo(np.int32).max)
_VMEM_LIMIT = 32 * 1024 * 1024    # explicit budget: safe on v5e/v6e (128 MiB) and v7x (64 MiB)


def _round_up(n, m):
    return ((n + m - 1) // m) * m


# --------------------------------------------------------------------------------------
# Kernel 1: first-occurrence flags.
#   first[j] = 1.0 iff no element with a smaller index equals x[j].
# --------------------------------------------------------------------------------------
def _first_occurrence(x_row, x_col, *, tj, ti):
    n = x_row.shape[1]
    grid_j, grid_i = n // tj, n // ti

    def kernel(x_row_ref, x_col_ref, first_ref, dup_acc):
        j = pl.program_id(0)
        i = pl.program_id(1)

        @pl.when(i == 0)
        def _():
            dup_acc[...] = jnp.zeros_like(dup_acc)

        # eq[il, jl] = (x[i] == x[j]) for this (i-tile, j-tile); broadcast (TI,1) vs (1,TJ).
        eq = x_col_ref[...] == x_row_ref[...]                                  # (ti, tj)
        gi = i * ti + jax.lax.broadcasted_iota(jnp.int32, (ti, 1), 0)          # global row idx
        gj = j * tj + jax.lax.broadcasted_iota(jnp.int32, (1, tj), 1)          # global col idx
        m = jnp.logical_and(eq, gi < gj)                                       # earlier duplicate

        # Row-sum (axis=0) on the MXU: ones(1,TI) @ mask -> (1,TJ), f32-accumulated (exact).
        dup_acc[...] += jnp.dot(jnp.ones((1, ti), jnp.bfloat16),
                                m.astype(jnp.bfloat16),
                                preferred_element_type=jnp.float32)

        @pl.when(i == grid_i - 1)
        def _():
            first_ref[...] = (dup_acc[...] < 0.5).astype(jnp.float32)

    return pl.pallas_call(
        kernel,
        out_shape=jax.ShapeDtypeStruct((1, n), jnp.float32),
        grid=(grid_j, grid_i),
        in_specs=[pl.BlockSpec((1, tj), lambda j, i: (0, j)),    # x as a row, blocked by j
                  pl.BlockSpec((ti, 1), lambda j, i: (i, 0))],   # x as a column, blocked by i
        out_specs=pl.BlockSpec((1, tj), lambda j, i: (0, j)),
        scratch_shapes=[pltpu.VMEM((1, tj), jnp.float32)],
        compiler_params=pltpu.CompilerParams(
            dimension_semantics=("parallel", "arbitrary"),       # j-tiles shard across v7x cores
            vmem_limit_bytes=_VMEM_LIMIT),
    )(x_row, x_col)


# --------------------------------------------------------------------------------------
# Kernel 2: inverse indices, counts, sorted unique values, num_unique.
#   inv[j]    = #distinct values < x[j]  = sum_i first[i] * (x[i] < x[j])
#   counts[u] = #{ j : inv[j] == u }
#   vals[u]   = the value of any j with inv[j] == u (all equal; min with INT32_MAX sentinel)
# --------------------------------------------------------------------------------------
def _inv_counts_vals(x_row, x_col, first_row, *, tj, ti):
    n = x_row.shape[1]
    grid_j, grid_i = n // tj, n // ti

    def kernel(x_row_ref, x_col_i_ref, x_col_j_ref, first_i_ref,
               inv_ref, counts_ref, vals_ref, n_ref,
               inv_acc, counts_acc, vals_acc):
        j = pl.program_id(0)
        i = pl.program_id(1)

        @pl.when(jnp.logical_and(j == 0, i == 0))
        def _():
            counts_acc[...] = jnp.zeros_like(counts_acc)
            vals_acc[...] = jnp.full(vals_acc.shape, _I32_MAX, jnp.int32)

        @pl.when(i == 0)
        def _():
            inv_acc[...] = jnp.zeros_like(inv_acc)

        # inv partial sum on the MXU: first(1,TI) @ [x_i < x_j](TI,TJ) -> (1,TJ).
        lt = (x_col_i_ref[...] < x_row_ref[...]).astype(jnp.bfloat16)          # (ti, tj)
        inv_acc[...] += jnp.dot(first_i_ref[...].astype(jnp.bfloat16), lt,
                                preferred_element_type=jnp.float32)

        @pl.when(i == grid_i - 1)
        def _():
            inv_i32 = inv_acc[...].astype(jnp.int32)          # exact integers in f32
            inv_ref[...] = inv_i32

            # member[jl, u] = (inv[jl] == u).  One tiny (1,tj)->(tj,1) relayout per j-tile
            # (tj elements) so counts/vals stay lane-dense (1, N) rows.
            inv_col = inv_i32.reshape(tj, 1)
            u_row = jax.lax.broadcasted_iota(jnp.int32, (1, n), 1)
            member = inv_col == u_row                         # (tj, n)

            # counts: MXU row-sum, exact in f32.
            counts_acc[...] += jnp.dot(jnp.ones((1, tj), jnp.bfloat16),
                                       member.astype(jnp.bfloat16),
                                       preferred_element_type=jnp.float32)

            # values: exact int32 min-select (all members of a rank share the same value).
            cand = jnp.min(jnp.where(member, x_col_j_ref[...], _I32_MAX),
                           axis=0, keepdims=True)             # (1, n)
            vals_acc[...] = jnp.minimum(vals_acc[...], cand)

        @pl.when(jnp.logical_and(j == grid_j - 1, i == grid_i - 1))
        def _():
            counts_i32 = counts_acc[...].astype(jnp.int32)
            counts_ref[...] = counts_i32
            vals_ref[...] = jnp.where(counts_i32 > 0, vals_acc[...], 0)   # zero-fill padding
            n_ref[...] = jnp.sum((counts_i32 > 0).astype(jnp.int32),
                                 axis=1, keepdims=True)

    return pl.pallas_call(
        kernel,
        out_shape=(jax.ShapeDtypeStruct((1, n), jnp.int32),   # inverse (per element)
                   jax.ShapeDtypeStruct((1, n), jnp.int32),   # counts (padded)
                   jax.ShapeDtypeStruct((1, n), jnp.int32),   # sorted unique values (padded)
                   jax.ShapeDtypeStruct((1, 1), jnp.int32)),  # num_unique
        grid=(grid_j, grid_i),
        in_specs=[pl.BlockSpec((1, tj), lambda j, i: (0, j)),   # x row, blocked by j
                  pl.BlockSpec((ti, 1), lambda j, i: (i, 0)),   # x column, blocked by i
                  pl.BlockSpec((tj, 1), lambda j, i: (j, 0)),   # x column, blocked by j
                  pl.BlockSpec((1, ti), lambda j, i: (0, i))],  # first flags, blocked by i
        out_specs=(pl.BlockSpec((1, tj), lambda j, i: (0, j)),
                   pl.BlockSpec((1, n), lambda j, i: (0, 0)),   # resident accumulator outputs
                   pl.BlockSpec((1, n), lambda j, i: (0, 0)),
                   pl.BlockSpec((1, 1), lambda j, i: (0, 0))),
        scratch_shapes=[pltpu.VMEM((1, tj), jnp.float32),       # inv accumulator
                        pltpu.VMEM((1, n), jnp.float32),        # counts accumulator
                        pltpu.VMEM((1, n), jnp.int32)],         # values accumulator
        compiler_params=pltpu.CompilerParams(
            dimension_semantics=("arbitrary", "arbitrary"),     # counts/vals accumulate over j
            vmem_limit_bytes=_VMEM_LIMIT),
    )(x_row, x_col, x_col, first_row)


# --------------------------------------------------------------------------------------
# Wrapper (layout plumbing only: reshape / pad / slice happen outside the kernels).
# --------------------------------------------------------------------------------------
def unique_flat(x):
    if not jnp.issubdtype(x.dtype, jnp.integer):
        # TODO(synk): float / int64 inputs need exact-compare support; only int32-range
        # integer data is handled (torch.unique preserves dtype and exact values).
        raise NotImplementedError("UniquePallas only supports integer inputs")
    flat = x.reshape(-1).astype(jnp.int32)
    n = flat.shape[0]
    n_pad = max(_TILE, _round_up(n, _TILE))
    pad = n_pad - n
    if pad:
        # Pad with copies of the first element: adds no new unique value; its count is
        # corrected below, and padded inverse entries are sliced away.
        flat = jnp.concatenate([flat, jnp.full((pad,), flat[0], jnp.int32)])

    x_row = flat.reshape(1, n_pad)
    x_col = flat.reshape(n_pad, 1)

    first = _first_occurrence(x_row, x_col, tj=_TILE, ti=_TILE)
    inv_o, counts_o, vals_o, num_o = _inv_counts_vals(x_row, x_col, first, tj=_TILE, ti=_TILE)

    inv_full = inv_o[0]
    counts_full = counts_o[0]
    vals_full = vals_o[0]
    num = num_o[0, 0]
    if pad:
        rank0 = inv_full[0]
        counts_full = counts_full - pad * (
            jnp.arange(n_pad, dtype=jnp.int32) == rank0).astype(jnp.int32)

    return vals_full[:n], inv_full[:n], counts_full[:n], num


class UniquePallas:
    """Pallas analogue of the PyTorch Unique module (dim=None only).

    Returns padded `values`/`counts` plus `num_unique` (valid region = [:num_unique]);
    values are sorted ascending (legal for both sorted=True and sorted=False).
    """

    def __init__(self, to_sort=False, return_inverse=False, return_counts=False, dim=None):
        self.to_sort = to_sort
        self.return_inverse = return_inverse
        self.return_counts = return_counts
        self.dim = dim
        # TODO(synk): dim is not None (unique rows along an axis) is not implemented.

    def __call__(self, x):
        assert self.dim is None, "dim != None not supported"
        vals, inv, counts, num = unique_flat(x)
        out = [vals]
        if self.return_inverse:
            out.append(inv.reshape(x.shape))   # torch: inverse has the input's shape
        if self.return_counts:
            out.append(counts)
        out.append(num)
        return tuple(out)


if __name__ == "__main__":
    key = jax.random.PRNGKey(0)
    # NCHW-like input with plenty of duplicates (incl. negatives); flattened N = 2*4*16*16 = 2048.
    x = jax.random.randint(key, (2, 4, 16, 16), -25, 25, dtype=jnp.int32)

    mod = UniquePallas(to_sort=True, return_inverse=True, return_counts=True, dim=None)
    values, inverse, counts, num_unique = mod(x)
    jax.block_until_ready((values, inverse, counts, num_unique))

    # Verify against numpy (same semantics as torch.unique with sorted=True).
    x_np = np.asarray(x)
    ref_vals, ref_inv, ref_counts = np.unique(x_np, return_inverse=True, return_counts=True)
    nu = int(num_unique)
    assert nu == ref_vals.size, (nu, ref_vals.size)
    np.testing.assert_array_equal(np.asarray(values)[:nu], ref_vals.astype(np.int32))
    np.testing.assert_array_equal(np.asarray(inverse).ravel(), ref_inv.ravel().astype(np.int32))
    np.testing.assert_array_equal(np.asarray(counts)[:nu], ref_counts.astype(np.int32))

    print("KERNEL_OK")
</pallas_src>

<mosaic_0001>
module attributes {stable_mosaic.version = 11 : i64} {
  func.func @kernel(%arg0: i32, %arg1: i32, %arg2: memref<1x256xi32, #tpu.memory_space<vmem>>, %arg3: memref<256x1xi32, #tpu.memory_space<vmem>>, %arg4: memref<1x256xf32, #tpu.memory_space<vmem>>, %arg5: memref<1x256xf32, #tpu.memory_space<vmem>>) attributes {dimension_semantics = [#tpu.dimension_semantics<parallel>, #tpu.dimension_semantics<arbitrary>], iteration_bounds = array<i64: 8, 8>, scalar_prefetch = 0 : i64, scratch_operands = 1 : i64, tpu.core_type = #tpu.core_type<tc>, window_params = [{transform_indices = @transform_0, window_bounds = array<i64: 1, 256>}, {transform_indices = @transform_1, window_bounds = array<i64: 256, 1>}, {transform_indices = @transform_2, window_bounds = array<i64: 1, 256>}]} {
    %c0_i32 = arith.constant 0 : i32
    %0 = arith.cmpi eq, %arg1, %c0_i32 : i32
    %1 = arith.extui %0 : i1 to i32
    %c0_i32_0 = arith.constant 0 : i32
    %2 = arith.cmpi ne, %1, %c0_i32_0 : i32
    scf.if %2 {
      %cst_11 = arith.constant 0.000000e+00 : f32
      %31 = vector.broadcast %cst_11 : f32 to vector<1x256xf32>
      %c0_12 = arith.constant 0 : index
      %c0_13 = arith.constant 0 : index
      %32 = vector.load %arg5[%c0_12, %c0_13] : memref<1x256xf32, #tpu.memory_space<vmem>>, vector<1x256xf32>
      tpu.vector_store %arg5[%c0_12, %c0_13], %31 {strides = array<i32>} : memref<1x256xf32, #tpu.memory_space<vmem>>, vector<1x256xf32>,
    } else {
    }
    %c0 = arith.constant 0 : index
    %c0_1 = arith.constant 0 : index
    %3 = vector.load %arg3[%c0, %c0_1] : memref<256x1xi32, #tpu.memory_space<vmem>>, vector<256x1xi32>
    %c0_2 = arith.constant 0 : index
    %c0_3 = arith.constant 0 : index
    %4 = vector.load %arg2[%c0_2, %c0_3] : memref<1x256xi32, #tpu.memory_space<vmem>>, vector<1x256xi32>
    %5 = vector.broadcast %3 : vector<256x1xi32> to vector<256x256xi32>
    %6 = vector.broadcast %4 : vector<1x256xi32> to vector<256x256xi32>
    %7 = arith.cmpi eq, %5, %6 : vector<256x256xi32>
    %c256_i32 = arith.constant 256 : i32
    %8 = arith.muli %arg1, %c256_i32 : i32
    %9 = tpu.iota {dimensions = array<i32: 0>} : vector<256x1xi32>
    %10 = vector.broadcast %8 : i32 to vector<256x1xi32>
    %11 = arith.addi %10, %9 : vector<256x1xi32>
    %c256_i32_4 = arith.constant 256 : i32
    %12 = arith.muli %arg0, %c256_i32_4 : i32
    %13 = tpu.iota {dimensions = array<i32: 1>} : vector<1x256xi32>
    %14 = vector.broadcast %12 : i32 to vector<1x256xi32>
    %15 = arith.addi %14, %13 : vector<1x256xi32>
    %16 = vector.broadcast %11 : vector<256x1xi32> to vector<256x256xi32>
    %17 = vector.broadcast %15 : vector<1x256xi32> to vector<256x256xi32>
    %18 = arith.cmpi slt, %16, %17 : vector<256x256xi32>
    %19 = arith.andi %7, %18 : vector<256x256xi1>
    %c0_5 = arith.constant 0 : index
    %c0_6 = arith.constant 0 : index
    %20 = vector.load %arg5[%c0_5, %c0_6] : memref<1x256xf32, #tpu.memory_space<vmem>>, vector<1x256xf32>
    %cst = arith.constant 1.000000e+00 : bf16
    %21 = vector.broadcast %cst : bf16 to vector<1x256xbf16>
    %22 = arith.extui %19 : vector<256x256xi1> to vector<256x256xi32>
    %23 = arith.sitofp %22 : vector<256x256xi32> to vector<256x256xf32>
    %24 = arith.truncf %23 : vector<256x256xf32> to vector<256x256xbf16>
    %cst_7 = arith.constant dense<0.000000e+00> : vector<1x256xf32>
    %25 = tpu.matmul %21, %24, %cst_7 {dimension_numbers = #tpu.dot_dimension_numbers<[1], [0], [0], [1], [0, 0, 1, 1], [], []>} : vector<1x256xbf16>, vector<256x256xbf16>, vector<1x256xf32> -> vector<1x256xf32>
    %26 = arith.addf %20, %25 : vector<1x256xf32>
    %c0_8 = arith.constant 0 : index
    %c0_9 = arith.constant 0 : index
    %27 = vector.load %arg5[%c0_8, %c0_9] : memref<1x256xf32, #tpu.memory_space<vmem>>, vector<1x256xf32>
    tpu.vector_store %arg5[%c0_8, %c0_9], %26 {strides = array<i32>} : memref<1x256xf32, #tpu.memory_space<vmem>>, vector<1x256xf32>,
    %c7_i32 = arith.constant 7 : i32
    %28 = arith.cmpi eq, %arg1, %c7_i32 : i32
    %29 = arith.extui %28 : i1 to i32
    %c0_i32_10 = arith.constant 0 : i32
    %30 = arith.cmpi ne, %29, %c0_i32_10 : i32
    scf.if %30 {
      %c0_11 = arith.constant 0 : index
      %c0_12 = arith.constant 0 : index
      %31 = vector.load %arg5[%c0_11, %c0_12] : memref<1x256xf32, #tpu.memory_space<vmem>>, vector<1x256xf32>
      %cst_13 = arith.constant 5.000000e-01 : f32
      %32 = vector.broadcast %cst_13 : f32 to vector<1x256xf32>
      %33 = arith.cmpf olt, %31, %32 : vector<1x256xf32>
      %34 = arith.extui %33 : vector<1x256xi1> to vector<1x256xi32>
      %35 = arith.sitofp %34 : vector<1x256xi32> to vector<1x256xf32>
      %c0_14 = arith.constant 0 : index
      %c0_15 = arith.constant 0 : index
      %36 = vector.load %arg4[%c0_14, %c0_15] : memref<1x256xf32, #tpu.memory_space<vmem>>, vector<1x256xf32>
      tpu.vector_store %arg4[%c0_14, %c0_15], %35 {strides = array<i32>} : memref<1x256xf32, #tpu.memory_space<vmem>>, vector<1x256xf32>,
    } else {
    }
    return
  }
  func.func @transform_0(%arg0: i32, %arg1: i32) -> (i32, i32) {
    %c0_i32 = arith.constant 0 : i32
    %c0_i32_0 = arith.constant 0 : i32
    return %c0_i32, %arg0 : i32, i32
  }
  func.func @transform_1(%arg0: i32, %arg1: i32) -> (i32, i32) {
    %c0_i32 = arith.constant 0 : i32
    %c0_i32_0 = arith.constant 0 : i32
    return %arg1, %c0_i32 : i32, i32
  }
  func.func @transform_2(%arg0: i32, %arg1: i32) -> (i32, i32) {
    %c0_i32 = arith.constant 0 : i32
    %c0_i32_0 = arith.constant 0 : i32
    return %c0_i32, %arg0 : i32, i32
  }
}

</mosaic_0001>

<bundles_post_ra>
// kernel: tpu_custom_call.1
= control target key start
LH: loop header
LB: loop body
LE: loop exit
PB: predicated region body
PF: predicated region fallthrough
CT: control target
= control target key end

     0   :  { %7 = vsyncpa [#allocation4], 0  ;;  %s1861_s0 = inlined_call_operand.vmem [shape: s32[1,2048], index: 0, kind: input, shape index: {}]   ;;  %s1862_s1 = inlined_call_operand.vmem [shape: s32[2048,1], index: 1, kind: input, shape index: {}]   ;;  %s1863_s2 = inlined_call_operand.hbm [shape: f32[1,2048], index: 2, kind: output, shape index: {}]  }
   0x1   :  { %9 = vsyncpa [#allocation4 + $0x1], 0  ;;  %s1253_s9 = smov 0   ;;  %s1255_s10 = smov 0  }
   0x2   :  { %s1257_s11 = smov 0   ;;  %s1259_s12 = smov 0  }
   0x3   :  { %s1261_s13 = smov 0   ;;  %s1263_s14 = smov 0  }
   0x4   :  { %s1265_s15 = smov 0   ;;  %s1267_s16 = smov 0  }
   0x5 LB: > { %s912_s17 = sadd.s32 4294967295, %s1231_s16   ;;  %s913_s18 = sadd.s32 4294967294, %s1231_s16   ;;  %s1231_s16 = sphi %s1267_s16, %s15_s16   ;;  %s1227_s15 = sphi %s1265_s15, %s1921_s15   ;;  %s1223_s14 = sphi %s1263_s14, %s1920_s14   ;;  %s1219_s13 = sphi %s1261_s13, %s1919_s13   ;;  %s1215_s12 = sphi %s1259_s12, %s1918_s12   ;;  %s1211_s11 = sphi %s1257_s11, %s1917_s11   ;;  %s1207_s10 = sphi %s1255_s10, %s1916_s10   ;;  %s1203_s9 = sphi %s1253_s9, %s1915_s9  }
   0x6   : > { %s24_s19 = sadd.s32 1, %s1223_s14  ;;  %s27_s20 = sadd.s32 1, %s1227_s15 }
   0x7   : > { %p25_p0 = scmp.ge.s32.totalorder %s24_s19, 8  ;;  %p96_p1 = scmp.ne.s32.totalorder %s1211_s11, %s1207_s10 }
   0x8   : > { %p97_p2 = scmp.eq.s32.totalorder %s912_s17, 63  ;;  %p102_p4 = scmp.ne.s32.totalorder %s1207_s10, %s1203_s9 }
   0x9   : > { %s1923_s19 = smov (%p25_p0, %s24_s19), 0  ;;  %s1925_s20 = smov (!%p25_p0, %s27_s20), %s1227_s15 }
   0xa   : > { %p1302_p3 = por %p97_p2, %p96_p1  ;;  %p29_p5 = scmp.ge.s32.totalorder %s1925_s20, 8 }
   0xb   : > { %p103_p6 = scmp.eq.s32.totalorder %s913_s18, 63  ;;  %p916_p7 = scmp.ge.s32.totalorder %s1231_s16, 1 }
   0xc   : > { %p138_p8 = scmp.lt.s32.totalorder %s1231_s16, 65  ;;  %s1927_s20 = smov (%p29_p5, %s1925_s20), 0 }
   0xd   : > { %p1312_p9 = por %p103_p6, %p102_p4  ;;  %s83_s23 = ssub.s32 %s1227_s15, %s1927_s20 }
   0xe   : > { %p139_p10 = pnand %p916_p7, %p138_p8  ;;  %s86_s24 = sadd.s32 1, %s1211_s11 }
   0xf   : > { %p84_p11 = scmp.eq.s32.totalorder %s83_s23, 0  ;;  %s161_s26 = sand.u32 (!%p139_p10), 1, %s1207_s10  }
  0x10   : > { %142 = sbr.rel (%p139_p10) target bundleno = 413 (0x19d), region = 28  ;;  %s1324_s27 = sshll.u32 (!%p139_p10), %s1219_s13, 1 }
  0x11   : > { %s1320_s25 = scalar_select %p84_p11, %s1211_s11, %s86_s24  }
  0x12   : > { %s1328_s28 = sshll.u32 (!%p139_p10), %s161_s26, 1  ;;  %p165_p12 = scmp.lt.s32.totalorder (!%p139_p10), %s1324_s27, 15 }
  0x13   : > { %s919_s29 = sshll.u32 (!%p139_p10), %s1215_s12, 5  ;;  %s163_s18 = scalar_lea.vmem (!%p139_p10), [#allocation3], %s1328_s28 }
  0x14   : > { %p170_p13 = scmp.lt.s32.totalorder (!%p139_p10), %s919_s29, 255  ;;  %p921_p0 = scmp.ne.s32.totalorder (!%p139_p10), %s1215_s12, 0 }
  0x15   : > { %s1333_s30 = scalar_select %p165_p12, %s1324_s27, 15 }
  0x16   : > { %s1929_s29 = smov (!%p170_p13, %s919_s29), 255  ;;  %180 = sbr.rel (%p921_p0) target bundleno = 31 (0x1f), region = 32 }
  0x17   : > { %s167_s5 = scalar_lea.vmem %s1861_s0, %s1333_s30  ;;  %s920_s6 = sshll.u32 %s1929_s29, 3 }
  0x18   : > { %s1342_s17 = scalar_lea.vmem %s1862_s1, %s920_s6 }
  0x1b   : > { %v181_v0 = vlaneseq  ;;  %v1233_v1 = vmov 0.0  }
  0x1d   : > { %vm183_vm0 = vcmp.lt.s32.totalorder %v181_v0, 256 }
  0x1e   : > { %185 = vst.msk [vmem:[#allocation2] sm:$0x3] %vm183_vm0, %v1233_v1 }
  0x1f PF: > { %v216_v2 = vld [vmem:[%s1342_s17 + $0xf0] sm:$0xff]  ;;  %v198_v4 = vld [vmem:[%s1342_s17 + $0x60] sm:$0xff]  ;;  %v1234_v5 = vmov 0   ;;  %v217_v6 = vld [vmem:[%s1342_s17 + $0xf8] sm:$0xff]  ;;  %v382_v37 = vlaneseq  ;;  %s922_s23 = sshll.u32 %s1215_s12, 8  ;;  %s923_s24 = sshll.u32 %s1219_s13, 8 }
  0x20   : > { %v200_v3 = vld [vmem:[%s1342_s17 + $0x70] sm:$0xff]  ;;  %1136 = vset.pattern.permute.xlu2 %v1234_v5  ;;  %1135 = vset.pattern.permute.xlu1 %v1234_v5  ;;  %v201_v7 = vld [vmem:[%s1342_s17 + $0x78] sm:$0xff]  ;;  %v199_v8 = vld [vmem:[%s1342_s17 + $0x68] sm:$0xff]  ;;  %v1393_v44 = vstv %s922_s23  ;;  %v1869_v62 = vmov 0  ;;  %v1871_v0 = vmov 0  ;;  %p1052_p1 = scmp.ne.s32.totalorder %s1215_s12, 7 }
  0x21   : > { %1134 = vset.pattern.permute.xlu0 %v1234_v5  ;;  %310 = vperm.xlu1 %1135, %v216_v2   ;;  %v215_v9 = vld [vmem:[%s1342_s17 + $0xe8] sm:$0xff]  ;;  %v214_v10 = vld [vmem:[%s1342_s17 + $0xe0] sm:$0xff]  ;;  %v196_v11 = vld [vmem:[%s1342_s17 + $0x50] sm:$0xff]  ;;  %v1379_v38 = vshrl.u32 %v382_v37, 7  ;;  %v450_v39 = vand.u32 127, %v382_v37  ;;  %v452_v45 = vstv %s923_s24  ;;  %v1873_v2 = vmov 0 }
  0x22   : > { %262 = vperm.xlu0 %1134, %v200_v3   ;;  %256 = vperm.xlu2 %1136, %v198_v4   ;;  %v212_v12 = vld [vmem:[%s1342_s17 + $0xd0] sm:$0xff]  ;;  %v197_v13 = vld [vmem:[%s1342_s17 + $0x58] sm:$0xff]  ;;  %v195_v15 = vld [vmem:[%s1342_s17 + $0x48] sm:$0xff] }
  0x23   : > { %v213_v14 = vld [vmem:[%s1342_s17 + $0xd8] sm:$0xff]  ;;  %v210_v16 = vld [vmem:[%s1342_s17 + $0xc0] sm:$0xff]  ;;  %v192_v18 = vld [vmem:[%s1342_s17 + $0x30] sm:$0xff]  ;;  %v395_v40 = vadd.s32 96, %v1379_v38  ;;  %v396_v42 = vadd.s32 104, %v1379_v38  ;;  %v451_v46 = vadd.s32 128, %v450_v39  ;;  %v1400_v51 = vadd.s32 %v452_v45, %v450_v39 }
  0x24   : > { %v194_v17 = vld [vmem:[%s1342_s17 + $0x40] sm:$0xff]  ;;  %v211_v19 = vld [vmem:[%s1342_s17 + $0xc8] sm:$0xff]  ;;  %v193_v20 = vld [vmem:[%s1342_s17 + $0x38] sm:$0xff]  ;;  %v413_v47 = vadd.s32 240, %v1379_v38  ;;  %v397_v49 = vadd.s32 112, %v1379_v38  ;;  %v414_v55 = vadd.s32 248, %v1379_v38 }
  0x25   : > { %v209_v21 = vld [vmem:[%s1342_s17 + $0xb8] sm:$0xff]  ;;  %v208_v22 = vld [vmem:[%s1342_s17 + $0xb0] sm:$0xff]  ;;  %v190_v23 = vld [vmem:[%s1342_s17 + $0x20] sm:$0xff]  ;;  %v428_v48 = vadd.s32 %v1393_v44, %v395_v40  ;;  %v429_v52 = vadd.s32 %v1393_v44, %v396_v42  ;;  %v1405_v54 = vadd.s32 %v452_v45, %v451_v46  ;;  %v398_v58 = vadd.s32 120, %v1379_v38 }
  0x26   : > { %v206_v24 = vld [vmem:[%s1342_s17 + $0xa0] sm:$0xff]  ;;  %v191_v25 = vld [vmem:[%s1342_s17 + $0x28] sm:$0xff]  ;;  %v189_v27 = vld [vmem:[%s1342_s17 + $0x18] sm:$0xff]  ;;  %v446_v56 = vadd.s32 %v1393_v44, %v413_v47  ;;  %v430_v59 = vadd.s32 %v1393_v44, %v397_v49  ;;  %v447_v63 = vadd.s32 %v1393_v44, %v414_v55  ;;  %v407_v39 = vadd.s32 192, %v1379_v38 }
  0x27   : > { %v207_v26 = vld [vmem:[%s1342_s17 + $0xa8] sm:$0xff]  ;;  %v204_v28 = vld [vmem:[%s1342_s17 + $0x90] sm:$0xff]  ;;  %v186_v30 = vld [vmem:[%s1342_s17] sm:$0xff]  ;;  %vm479_vm2 = vcmp.lt.s32.totalorder %v428_v48, %v1400_v51  ;;  %vm480_vm4 = vcmp.lt.s32.totalorder %v428_v48, %v1405_v54  ;;  %vm481_vm6 = vcmp.lt.s32.totalorder %v429_v52, %v1400_v51  ;;  %vm482_vm9 = vcmp.lt.s32.totalorder %v429_v52, %v1405_v54 }
  0x28   : > { %v188_v29 = vld [vmem:[%s1342_s17 + $0x10] sm:$0xff]  ;;  %v205_v31 = vld [vmem:[%s1342_s17 + $0x98] sm:$0xff]  ;;  %v187_v32 = vld [vmem:[%s1342_s17 + $0x8] sm:$0xff]  ;;  %vm515_vm11 = vcmp.lt.s32.totalorder %v446_v56, %v1400_v51  ;;  %v431_v1 = vadd.s32 %v1393_v44, %v398_v58  ;;  %vm483_vm14 = vcmp.lt.s32.totalorder %v430_v59, %v1400_v51  ;;  %v389_v45 = vadd.s32 48, %v1379_v38 }
  0x29   : > { %313 = vperm.xlu1 %1135, %v217_v6   ;;  %v203_v33 = vld [vmem:[%s1342_s17 + $0x88] sm:$0xff]  ;;  %v202_v34 = vld [vmem:[%s1342_s17 + $0x80] sm:$0xff]  ;;  %v412_v6 = vadd.s32 232, %v1379_v38  ;;  %v408_v49 = vadd.s32 200, %v1379_v38  ;;  %v387_v3 = vadd.s32 32, %v1379_v38  ;;  %v388_v5 = vadd.s32 40, %v1379_v38 }
  0x2a   : > { %265 = vperm.xlu0 %1134, %v201_v7   ;;  %259 = vperm.xlu2 %1136, %v199_v8   ;;  %v218_v43 = vld [vmem:[%s167_s5] sm:$0x3]  ;;  %v422_v55 = vadd.s32 %v1393_v44, %v389_v45 }
  0x2b   : > { %v1398_v50 = vperm.slane %v218_v43, 0  ;;  %v1403_v53 = vperm.slane %v218_v43, 1  ;;  %v440_v43 = vadd.s32 %v1393_v44, %v407_v39  ;;  %v420_v8 = vadd.s32 %v1393_v44, %v387_v3 }
  0x31   : > { %307 = vperm.xlu1 %1135, %v215_v9   ;;  %v411_v9 = vadd.s32 224, %v1379_v38 }
  0x32   : > { %304 = vperm.xlu0 %1134, %v214_v10   ;;  %250 = vperm.xlu2 %1136, %v196_v11   ;;  %v393_v10 = vadd.s32 80, %v1379_v38 }
  0x39   : > { %298 = vperm.xlu1 %1135, %v212_v12  }
  0x3a   : > { %253 = vperm.xlu0 %1134, %v197_v13   ;;  %301 = vperm.xlu2 %1136, %v213_v14   ;;  %v445_v14 = vadd.s32 %v1393_v44, %v412_v6 }
  0x41   : > { %247 = vperm.xlu1 %1135, %v195_v15  }
  0x42   : > { %292 = vperm.xlu2 %1136, %v210_v16   ;;  %244 = vperm.xlu0 %1134, %v194_v17   ;;  %v444_v16 = vadd.s32 %v1393_v44, %v411_v9  ;;  %v426_v17 = vadd.s32 %v1393_v44, %v393_v10  ;;  %v404_v9 = vadd.s32 168, %v1379_v38 }
  0x44   : > { %v437_v13 = vadd.s32 %v1393_v44, %v404_v9 }
  0x49   : > { %238 = vperm.xlu1 %1135, %v192_v18   ;;  %v1235_v18 = vmov 1.0|1.0  }
  0x4a   : > { %295 = vperm.xlu0 %1134, %v211_v19   ;;  %241 = vperm.xlu2 %1136, %v193_v20   ;;  %v410_v19 = vadd.s32 216, %v1379_v38  ;;  %v409_v20 = vadd.s32 208, %v1379_v38 }
  0x51   : > { %289 = vperm.xlu1 %1135, %v209_v21  }
  0x52   : > { %286 = vperm.xlu0 %1134, %v208_v22   ;;  %232 = vperm.xlu2 %1136, %v190_v23   ;;  %v394_v22 = vadd.s32 88, %v1379_v38 }
  0x59   : > { %280 = vperm.xlu1 %1135, %v206_v24   ;;  %v443_v24 = vadd.s32 %v1393_v44, %v410_v19  ;;  %v386_v19 = vadd.s32 24, %v1379_v38 }
  0x5a   : > { %235 = vperm.xlu0 %1134, %v191_v25   ;;  %283 = vperm.xlu2 %1136, %v207_v26   ;;  %v442_v26 = vadd.s32 %v1393_v44, %v409_v20 }
  0x61   : > { %229 = vperm.xlu1 %1135, %v189_v27   ;;  %v427_v27 = vadd.s32 %v1393_v44, %v394_v22 }
  0x62   : > { %274 = vperm.xlu2 %1136, %v204_v28   ;;  %226 = vperm.xlu0 %1134, %v188_v29   ;;  %v416_v29 = vadd.s32 %v1393_v44, %v1379_v38 }
  0x69   : > { %220 = vperm.xlu1 %1135, %v186_v30   ;;  %v392_v30 = vadd.s32 72, %v1379_v38 }
  0x6a   : > { %277 = vperm.xlu0 %1134, %v205_v31   ;;  %223 = vperm.xlu2 %1136, %v187_v32   ;;  %v390_v31 = vadd.s32 56, %v1379_v38 }
  0x6b   : > { %v425_v40 = vadd.s32 %v1393_v44, %v392_v30 }
  0x71   : > { %271 = vperm.xlu1 %1135, %v203_v33  }
  0x72   : > { %268 = vperm.xlu0 %1134, %v202_v34   ;;  %v391_v34 = vadd.s32 64, %v1379_v38 }
  0x74   : > { %v424_v42 = vadd.s32 %v1393_v44, %v391_v34 }
  0x7c   : > { %v257_v35 = vpop.permute.xlu2 %256 }
  0x7d   : > { %vm341_vm1 = vcmp.eq.s32.totalorder %v257_v35, %v1398_v50  ;;  %vm342_vm3 = vcmp.eq.s32.totalorder %v257_v35, %v1403_v53 }
  0x7e   : > { %vm1420_vm8 = vmand %vm341_vm1, %vm479_vm2  ;;  %vm484_vm1 = vcmp.lt.s32.totalorder %v430_v59, %v1405_v54 }
  0x7f   : > { %v1870_v62 = vsel %vm1420_vm8, 4294967295, %v1869_v62  ;;  %vm1430_vm12 = vmand %vm342_vm3, %vm480_vm4  ;;  %vm486_vm8 = vcmp.lt.s32.totalorder %v431_v1, %v1405_v54 }
  0x80   : > { %v1872_v0 = vsel %vm1430_vm12, 4294967295, %v1871_v0  ;;  %vm516_vm12 = vcmp.lt.s32.totalorder %v446_v56, %v1405_v54 }
  0x84   : > { %v260_v36 = vpop.permute.xlu2 %259 }
  0x85   : > { %vm343_vm5 = vcmp.eq.s32.totalorder %v260_v36, %v1398_v50  ;;  %vm344_vm7 = vcmp.eq.s32.totalorder %v260_v36, %v1403_v53  ;;  %v400_v36 = vadd.s32 136, %v1379_v38 }
  0x86   : > { %vm1437_vm15 = vmand %vm343_vm5, %vm481_vm6  ;;  %vm517_vm6 = vcmp.lt.s32.totalorder %v447_v63, %v1400_v51 }
  0x87   : > { %v1874_v2 = vsel %vm1437_vm15, 4294967295, %v1873_v2  ;;  %vm1443_vm2 = vmand %vm344_vm7, %vm482_vm9  ;;  %vm485_vm7 = vcmp.lt.s32.totalorder %v431_v1, %v1400_v51  ;;  %vm1887_vm15 = vnez %v1872_v0  ;;  %v405_v0 = vadd.s32 176, %v1379_v38 }
  0x8c   : > { %v1385_v41 = vpop.permute.xlu2 %250 }
  0x93   : > { %v311_v57 = vpop.permute.xlu1 %310 }
  0x94   : > { %v263_v60 = vpop.permute.xlu0 %262  ;;  %v1418_v61 = vpop.permute.xlu2 %301  ;;  %vm377_vm10 = vcmp.eq.s32.totalorder %v311_v57, %v1398_v50  ;;  %vm378_vm3 = vcmp.eq.s32.totalorder %v311_v57, %v1403_v53  ;;  %v441_v57 = vadd.s32 %v1393_v44, %v408_v49 }
  0x95   : > { %vm345_vm13 = vcmp.eq.s32.totalorder %v263_v60, %v1398_v50  ;;  %vm346_vm0 = vcmp.eq.s32.totalorder %v263_v60, %v1403_v53  ;;  %vm1448_vm4 = vmand %vm377_vm10, %vm515_vm11  ;;  %v406_v60 = vadd.s32 184, %v1379_v38 }
  0x96   : > { %vm1453_vm5 = vmand %vm345_vm13, %vm483_vm14 }
  0x97   : > { %vm1460_vm9 = vmand %vm346_vm0, %vm484_vm1  ;;  %v439_v1 = vadd.s32 %v1393_v44, %v406_v60 }
  0x98   : > { %vm1471_vm13 = vmand %vm378_vm3, %vm516_vm12 }
  0x9b   : > { %v314_v7 = vpop.permute.xlu1 %313 }
  0x9c   : > { %vm379_vm11 = vcmp.eq.s32.totalorder %v314_v7, %v1398_v50  ;;  %v266_v11 = vpop.permute.xlu0 %265  ;;  %v1487_v15 = vpop.permute.xlu2 %292  ;;  %vm380_vm3 = vcmp.eq.s32.totalorder %v314_v7, %v1403_v53  ;;  %v403_v7 = vadd.s32 160, %v1379_v38 }
  0x9d   : > { %vm347_vm14 = vcmp.eq.s32.totalorder %v266_v11, %v1398_v50  ;;  %vm1476_vm0 = vmand %vm379_vm11, %vm517_vm6  ;;  %vm348_vm1 = vcmp.eq.s32.totalorder %v266_v11, %v1403_v53  ;;  %v421_v11 = vadd.s32 %v1393_v44, %v388_v5 }
  0x9e   : > { %vm549_vm10 = vmand %vm347_vm14, %vm485_vm7  ;;  %vm518_vm7 = vcmp.lt.s32.totalorder %v447_v63, %v1405_v54  ;;  %vm513_vm14 = vcmp.lt.s32.totalorder %v445_v14, %v1400_v51  ;;  %v436_v12 = vadd.s32 %v1393_v44, %v403_v7 }
  0x9f   : > { %vm988_vm12 = vmpackc.low %vm549_vm10, %vm1453_vm5 }
  0xa0   : > { %989 = vmatpush.bf16.msk.msra.mxu0 %vm988_vm12, %v1235_v18  ;;  %vm1004_vm6 = vmpackc.low %vm1476_vm0, %vm1448_vm4  ;;  %vm511_vm0 = vcmp.lt.s32.totalorder %v444_v16, %v1400_v51  ;;  %vm372_vm12 = vcmp.eq.s32.totalorder %v1418_v61, %v1403_v53 }
  0xa1   : > { %1005 = vmatpush.bf16.msk.msra.mxu1 %vm1004_vm6, %v1235_v18  ;;  %vm550_vm5 = vmand %vm348_vm1, %vm486_vm8  ;;  %vm475_vm8 = vcmp.lt.s32.totalorder %v426_v17, %v1400_v51 }
  0xa2   : > { %vm1888_vm10 = vmmov %vm1460_vm9  ;;  %vm476_vm9 = vcmp.lt.s32.totalorder %v426_v17, %v1405_v54  ;;  %v385_v17 = vadd.s32 16, %v1379_v38 }
  0xa3   : > { %vm1020_vm11 = vmpackc.low %vm550_vm5, %vm1888_vm10  ;;  %v308_v21 = vpop.permute.xlu1 %307  ;;  %vm1889_vm5 = vnez %v1874_v2  ;;  %vm1890_vm10 = vnez %v1870_v62  ;;  %v438_v2 = vadd.s32 %v1393_v44, %v405_v0 }
  0xa4   : > { %1021 = vmatpush.bf16.msk.msra.mxu2 %vm1020_vm11, %v1235_v18  ;;  %vm582_vm4 = vmand %vm380_vm3, %vm518_vm7  ;;  %vm375_vm6 = vcmp.eq.s32.totalorder %v308_v21, %v1398_v50  ;;  %v305_v23 = vpop.permute.xlu0 %304  ;;  %v1562_v28 = vpop.permute.xlu2 %241  ;;  %v418_v22 = vadd.s32 %v1393_v44, %v385_v17 }
  0xa5   : > { %vm1036_vm1 = vmpackc.low %vm582_vm4, %vm1471_vm13  ;;  %vm373_vm3 = vcmp.eq.s32.totalorder %v305_v23, %v1398_v50  ;;  %vm374_vm7 = vcmp.eq.s32.totalorder %v305_v23, %v1403_v53  ;;  %vm512_vm4 = vcmp.lt.s32.totalorder %v444_v16, %v1405_v54 }
  0xa6   : > { %vm1891_vm11 = vmpackc.low %vm1889_vm5, %vm1890_vm10  ;;  %1037 = vmatpush.bf16.msk.msra.mxu3 %vm1036_vm1, %v1235_v18  ;;  %vm376_vm5 = vcmp.eq.s32.totalorder %v308_v21, %v1403_v53  ;;  %vm514_vm1 = vcmp.lt.s32.totalorder %v445_v14, %v1405_v54 }
  0xa7   : > { %991 = vmatpush.bf16.msk.msra.mxu0 %vm1891_vm11, %v1235_v18  ;;  %vm577_vm13 = vmand %vm375_vm6, %vm513_vm14  ;;  %vm1892_vm11 = vcmp.eq.s32.totalorder %v1385_v41, %v1398_v50 }
  0xa8   : > { %vm575_vm10 = vmand %vm373_vm3, %vm511_vm0  ;;  %vm371_vm3 = vcmp.eq.s32.totalorder %v1418_v61, %v1398_v50 }
  0xa9   : > { %vm1542_vm14 = vmand %vm1892_vm11, %vm475_vm8  ;;  %vm509_vm11 = vcmp.lt.s32.totalorder %v443_v24, %v1400_v51 }
  0xaa   : > { %vm1895_vm6 = vmpackc.low %vm1443_vm2, %vm1887_vm15  ;;  %vm1896_vm2 = vcmp.eq.s32.totalorder %v1385_v41, %v1403_v53  ;;  %v423_v41 = vadd.s32 %v1393_v44, %v390_v31 }
  0xab   : > { %1023 = vmatpush.bf16.msk.msra.mxu2 %vm1895_vm6, %v1235_v18  ;;  %vm1006_vm0 = vmpackc.low %vm577_vm13, %vm575_vm10  ;;  %vm510_vm10 = vcmp.lt.s32.totalorder %v443_v24, %v1405_v54  ;;  %v299_v32 = vpop.permute.xlu1 %298  ;;  %v419_v24 = vadd.s32 %v1393_v44, %v386_v19 }
  0xac   : > { %1007 = vmatpush.bf16.msk.msra.mxu1 %vm1006_vm0, %v1235_v18  ;;  %vm576_vm8 = vmand %vm374_vm7, %vm512_vm4  ;;  %vm507_vm4 = vcmp.lt.s32.totalorder %v442_v26, %v1400_v51  ;;  %v254_v35 = vpop.permute.xlu0 %253  ;;  %v1618_v46 = vpop.permute.xlu2 %232 }
  0xad   : > { %vm578_vm15 = vmand %vm376_vm5, %vm514_vm1  ;;  %vm477_vm5 = vcmp.lt.s32.totalorder %v427_v27, %v1400_v51  ;;  %vm369_vm1 = vcmp.eq.s32.totalorder %v299_v32, %v1398_v50  ;;  %vm339_vm0 = vcmp.eq.s32.totalorder %v254_v35, %v1398_v50 }
  0xae   : > { %vm1569_vm13 = vmand %vm1896_vm2, %vm476_vm9  ;;  %vm370_vm2 = vcmp.eq.s32.totalorder %v299_v32, %v1403_v53 }
  0xaf   : > { %vm1038_vm7 = vmpackc.low %vm578_vm15, %vm576_vm8  ;;  %vm340_vm8 = vcmp.eq.s32.totalorder %v254_v35, %v1403_v53  ;;  %vm478_vm15 = vcmp.lt.s32.totalorder %v427_v27, %v1405_v54  ;;  %v399_v35 = vadd.s32 128, %v1379_v38 }
  0xb0   : > { %1039 = vmatpush.bf16.msk.msra.mxu3 %vm1038_vm7, %v1235_v18  ;;  %vm1582_vm9 = vmand %vm371_vm3, %vm509_vm11  ;;  %vm508_vm7 = vcmp.lt.s32.totalorder %v442_v26, %v1405_v54  ;;  %v401_v26 = vadd.s32 144, %v1379_v38 }
  0xb1   : > { %vm1591_vm6 = vmand %vm372_vm12, %vm510_vm10  ;;  %v432_v39 = vadd.s32 %v1393_v44, %v399_v35 }
  0xb2   : > { %vm571_vm3 = vmand %vm369_vm1, %vm507_vm4  ;;  %vm473_vm1 = vcmp.lt.s32.totalorder %v425_v40, %v1400_v51  ;;  %v434_v30 = vadd.s32 %v1393_v44, %v401_v26 }
  0xb3   : > { %vm541_vm11 = vmand %vm339_vm0, %vm477_vm5  ;;  %vm331_vm5 = vcmp.eq.s32.totalorder %v1562_v28, %v1398_v50  ;;  %vm469_vm0 = vcmp.lt.s32.totalorder %v423_v41, %v1400_v51  ;;  %v248_v47 = vpop.permute.xlu1 %247 }
  0xb4   : > { %vm992_vm12 = vmpackc.low %vm541_vm11, %vm1542_vm14  ;;  %vm335_vm11 = vcmp.eq.s32.totalorder %v248_v47, %v1398_v50  ;;  %v245_v48 = vpop.permute.xlu0 %244  ;;  %v1675_v63 = vpop.permute.xlu2 %283 }
  0xb5   : > { %993 = vmatpush.bf16.msk.msra.mxu0 %vm992_vm12, %v1235_v18  ;;  %vm1008_vm10 = vmpackc.low %vm1582_vm9, %vm571_vm3  ;;  %vm471_vm3 = vcmp.lt.s32.totalorder %v424_v42, %v1400_v51  ;;  %vm333_vm12 = vcmp.eq.s32.totalorder %v245_v48, %v1398_v50 }
  0xb6   : > { %1009 = vmatpush.bf16.msk.msra.mxu1 %vm1008_vm10, %v1235_v18  ;;  %vm542_vm4 = vmand %vm340_vm8, %vm478_vm15  ;;  %vm365_vm8 = vcmp.eq.s32.totalorder %v1487_v15, %v1398_v50  ;;  %vm503_vm15 = vcmp.lt.s32.totalorder %v440_v43, %v1400_v51 }
  0xb7   : > { %vm1024_vm14 = vmpackc.low %vm542_vm4, %vm1569_vm13  ;;  %vm336_vm4 = vcmp.eq.s32.totalorder %v248_v47, %v1403_v53 }
  0xb8   : > { %1025 = vmatpush.bf16.msk.msra.mxu2 %vm1024_vm14, %v1235_v18  ;;  %vm572_vm9 = vmand %vm370_vm2, %vm508_vm7  ;;  %vm334_vm2 = vcmp.eq.s32.totalorder %v245_v48, %v1403_v53  ;;  %vm472_vm7 = vcmp.lt.s32.totalorder %v424_v42, %v1405_v54  ;;  %v583_v48 = vld [vmem:[#allocation2] sm:$0x3] }
  0xb9   : > { %vm1040_vm13 = vmpackc.low %vm1591_vm6, %vm572_vm9  ;;  %vm474_vm9 = vcmp.lt.s32.totalorder %v425_v40, %v1405_v54  ;;  %v433_v40 = vadd.s32 %v1393_v44, %v400_v36 }
  0xba   : > { %1041 = vmatpush.bf16.msk.msra.mxu3 %vm1040_vm13, %v1235_v18  ;;  %vm537_vm10 = vmand %vm335_vm11, %vm473_vm1  ;;  %vm366_vm11 = vcmp.eq.s32.totalorder %v1487_v15, %v1403_v53  ;;  %v384_v15 = vadd.s32 8, %v1379_v38 }
  0xbb   : > { %vm1640_vm6 = vmand %vm331_vm5, %vm469_vm0  ;;  %vm332_vm5 = vcmp.eq.s32.totalorder %v1562_v28, %v1403_v53  ;;  %v239_v58 = vpop.permute.xlu1 %238  ;;  %v402_v28 = vadd.s32 152, %v1379_v38 }
  0xbc   : > { %vm535_vm14 = vmand %vm333_vm12, %vm471_vm3  ;;  %vm470_vm3 = vcmp.lt.s32.totalorder %v423_v41, %v1405_v54  ;;  %v296_v61 = vpop.permute.xlu0 %295  ;;  %v1706_v10 = vpop.permute.xlu2 %274  ;;  %v417_v20 = vadd.s32 %v1393_v44, %v384_v15  ;;  %v1236_v41 = vmov 1065369472  }
  0xbd   : > { %vm994_vm13 = vmpackc.low %vm537_vm10, %vm535_vm14  ;;  %vm504_vm10 = vcmp.lt.s32.totalorder %v440_v43, %v1405_v54  ;;  %v435_v32 = vadd.s32 %v1393_v44, %v402_v28 }
  0xbe   : > { %vm1650_vm1 = vmand %vm365_vm8, %vm503_vm15  ;;  %995 = vmatpush.bf16.msk.msra.mxu0 %vm994_vm13, %v1235_v18  ;;  %vm467_vm15 = vcmp.lt.s32.totalorder %v422_v55, %v1400_v51 }
  0xbf   : > { %vm536_vm0 = vmand %vm334_vm2, %vm472_vm7  ;;  %vm329_vm2 = vcmp.eq.s32.totalorder %v239_v58, %v1398_v50  ;;  %vm505_vm7 = vcmp.lt.s32.totalorder %v441_v57, %v1400_v51 }
  0xc0   : > { %vm538_vm12 = vmand %vm336_vm4, %vm474_vm9  ;;  %vm367_vm9 = vcmp.eq.s32.totalorder %v296_v61, %v1398_v50 }
  0xc1   : > { %vm1026_vm8 = vmpackc.low %vm538_vm12, %vm536_vm0  ;;  %vm368_vm12 = vcmp.eq.s32.totalorder %v296_v61, %v1403_v53 }
  0xc2   : > { %1027 = vmatpush.bf16.msk.msra.mxu2 %vm1026_vm8, %v1235_v18  ;;  %vm1664_vm14 = vmand %vm332_vm5, %vm470_vm3  ;;  %vm330_vm5 = vcmp.eq.s32.totalorder %v239_v58, %v1403_v53  ;;  %vm468_vm3 = vcmp.lt.s32.totalorder %v422_v55, %v1405_v54  ;;  %vm506_vm8 = vcmp.lt.s32.totalorder %v441_v57, %v1405_v54 }
  0xc3   : > { %vm1671_vm4 = vmand %vm366_vm11, %vm504_vm10  ;;  %v290_v4 = vpop.permute.xlu1 %289 }
  0xc4   : > { %vm531_vm13 = vmand %vm329_vm2, %vm467_vm15  ;;  %v287_v6 = vpop.permute.xlu0 %286  ;;  %v224_v21 = vpop.permute.xlu2 %223 }
  0xc5   : > { %vm996_vm0 = vmpackc.low %vm1640_vm6, %vm531_vm13  ;;  %vm499_vm13 = vcmp.lt.s32.totalorder %v438_v2, %v1400_v51 }
  0xc6   : > { %997 = vmatpush.bf16.msk.msra.mxu0 %vm996_vm0, %v1235_v18  ;;  %vm569_vm11 = vmand %vm367_vm9, %vm505_vm7  ;;  %vm501_vm7 = vcmp.lt.s32.totalorder %v439_v1, %v1400_v51  ;;  %vm363_vm9 = vcmp.eq.s32.totalorder %v290_v4, %v1398_v50  ;;  %vm500_vm0 = vcmp.lt.s32.totalorder %v438_v2, %v1405_v54 }
  0xc7   : > { %vm1010_vm10 = vmpackc.low %vm569_vm11, %vm1650_vm1 }
  0xc8   : > { %1011 = vmatpush.bf16.msk.msra.mxu1 %vm1010_vm10, %v1235_v18  ;;  %vm532_vm15 = vmand %vm330_vm5, %vm468_vm3  ;;  %vm364_vm3 = vcmp.eq.s32.totalorder %v290_v4, %v1403_v53 }
  0xc9   : > { %vm1028_vm6 = vmpackc.low %vm1664_vm14, %vm532_vm15  ;;  %vm361_vm14 = vcmp.eq.s32.totalorder %v287_v6, %v1398_v50 }
  0xca   : > { %1029 = vmatpush.bf16.msk.msra.mxu2 %vm1028_vm6, %v1235_v18  ;;  %vm570_vm2 = vmand %vm368_vm12, %vm506_vm8  ;;  %vm502_vm12 = vcmp.lt.s32.totalorder %v439_v1, %v1405_v54  ;;  %vm325_vm8 = vcmp.eq.s32.totalorder %v1618_v46, %v1398_v50  ;;  %vm463_vm6 = vcmp.lt.s32.totalorder %v420_v8, %v1400_v51 }
  0xcb   : > { %vm1042_vm1 = vmpackc.low %vm570_vm2, %vm1671_vm4  ;;  %vm362_vm4 = vcmp.eq.s32.totalorder %v287_v6, %v1403_v53  ;;  %v281_v14 = vpop.permute.xlu1 %280 }
  0xcc   : > { %1043 = vmatpush.bf16.msk.msra.mxu3 %vm1042_vm1, %v1235_v18  ;;  %vm565_vm5 = vmand %vm363_vm9, %vm501_vm7  ;;  %vm465_vm7 = vcmp.lt.s32.totalorder %v421_v11, %v1400_v51  ;;  %v236_v16 = vpop.permute.xlu0 %235  ;;  %vm357_vm9 = vcmp.eq.s32.totalorder %v281_v14, %v1398_v50 }
  0xcd   : > { %vm563_vm11 = vmand %vm361_vm14, %vm499_vm13  ;;  %vm327_vm14 = vcmp.eq.s32.totalorder %v236_v16, %v1398_v50 }
  0xce   : > { %vm1012_vm10 = vmpackc.low %vm565_vm5, %vm563_vm11  ;;  %vm495_vm5 = vcmp.lt.s32.totalorder %v436_v12, %v1400_v51 }
  0xcf   : > { %1013 = vmatpush.bf16.msk.msra.mxu1 %vm1012_vm10, %v1235_v18  ;;  %vm564_vm15 = vmand %vm362_vm4, %vm500_vm0  ;;  %vm359_vm4 = vcmp.eq.s32.totalorder %v1675_v63, %v1398_v50 }
  0xd0   : > { %vm566_vm2 = vmand %vm364_vm3, %vm502_vm12  ;;  %vm497_vm3 = vcmp.lt.s32.totalorder %v437_v13, %v1400_v51  ;;  %vm326_vm12 = vcmp.eq.s32.totalorder %v1618_v46, %v1403_v53 }
  0xd1   : > { %vm1044_vm1 = vmpackc.low %vm566_vm2, %vm564_vm15  ;;  %vm328_vm15 = vcmp.eq.s32.totalorder %v236_v16, %v1403_v53  ;;  %vm466_vm2 = vcmp.lt.s32.totalorder %v421_v11, %v1405_v54 }
  0xd2   : > { %1045 = vmatpush.bf16.msk.msra.mxu3 %vm1044_vm1, %v1235_v18  ;;  %vm527_vm13 = vmand %vm325_vm8, %vm463_vm6  ;;  %vm464_vm8 = vcmp.lt.s32.totalorder %v420_v8, %v1405_v54  ;;  %vm358_vm1 = vcmp.eq.s32.totalorder %v281_v14, %v1403_v53 }
  0xd3   : > { %vm529_vm0 = vmand %vm327_vm14, %vm465_vm7  ;;  %v230_v23 = vpop.permute.xlu1 %229 }
  0xd4   : > { %vm998_vm11 = vmpackc.low %vm529_vm0, %vm527_vm13  ;;  %vm496_vm13 = vcmp.lt.s32.totalorder %v436_v12, %v1405_v54  ;;  %v227_v25 = vpop.permute.xlu0 %226 }
  0xd5   : > { %999 = vmatpush.bf16.msk.msra.mxu0 %vm998_vm11, %v1235_v18  ;;  %vm559_vm10 = vmand %vm357_vm9, %vm495_vm5  ;;  %vm360_vm9 = vcmp.eq.s32.totalorder %v1675_v63, %v1403_v53  ;;  %vm457_vm5 = vcmp.lt.s32.totalorder %v417_v20, %v1400_v51 }
  0xd6   : > { %vm561_vm6 = vmand %vm359_vm4, %vm497_vm3  ;;  %vm319_vm4 = vcmp.eq.s32.totalorder %v224_v21, %v1398_v50  ;;  %vm498_vm3 = vcmp.lt.s32.totalorder %v437_v13, %v1405_v54 }
  0xd7   : > { %vm1014_vm7 = vmpackc.low %vm561_vm6, %vm559_vm10  ;;  %vm321_vm10 = vcmp.eq.s32.totalorder %v227_v25, %v1398_v50 }
  0xd8   : > { %1015 = vmatpush.bf16.msk.msra.mxu1 %vm1014_vm7, %v1235_v18  ;;  %vm528_vm14 = vmand %vm326_vm12, %vm464_vm8  ;;  %vm459_vm8 = vcmp.lt.s32.totalorder %v418_v22, %v1400_v51 }
  0xd9   : > { %vm530_vm0 = vmand %vm328_vm15, %vm466_vm2  ;;  %vm323_vm15 = vcmp.eq.s32.totalorder %v230_v23, %v1398_v50  ;;  %vm461_vm2 = vcmp.lt.s32.totalorder %v419_v24, %v1400_v51 }
  0xda   : > { %vm1030_vm11 = vmpackc.low %vm530_vm0, %vm528_vm14  ;;  %vm324_vm0 = vcmp.eq.s32.totalorder %v230_v23, %v1403_v53 }
  0xdb   : > { %1031 = vmatpush.bf16.msk.msra.mxu2 %vm1030_vm11, %v1235_v18  ;;  %vm560_vm12 = vmand %vm358_vm1, %vm496_vm13  ;;  %vm458_vm1 = vcmp.lt.s32.totalorder %v417_v20, %v1405_v54  ;;  %vm320_vm13 = vcmp.eq.s32.totalorder %v224_v21, %v1403_v53  ;;  %vm462_vm11 = vcmp.lt.s32.totalorder %v419_v24, %v1405_v54  ;;  %v221_v31 = vpop.permute.xlu1 %220 }
  0xdc   : > { %vm1751_vm6 = vmand %vm319_vm4, %vm457_vm5  ;;  %vm322_vm5 = vcmp.eq.s32.totalorder %v227_v25, %v1403_v53  ;;  %v278_v34 = vpop.permute.xlu0 %277 }
  0xdd   : > { %vm562_vm7 = vmand %vm360_vm9, %vm498_vm3  ;;  %vm460_vm9 = vcmp.lt.s32.totalorder %v418_v22, %v1405_v54 }
  0xde   : > { %vm1046_vm14 = vmpackc.low %vm562_vm7, %vm560_vm12 }
  0xdf   : > { %1047 = vmatpush.bf16.msk.msra.mxu3 %vm1046_vm14, %v1235_v18  ;;  %vm523_vm4 = vmand %vm321_vm10, %vm459_vm8  ;;  %vm317_vm8 = vcmp.eq.s32.totalorder %v221_v31, %v1398_v50  ;;  %vm353_vm14 = vcmp.eq.s32.totalorder %v1706_v10, %v1398_v50 }
  0xe0   : > { %vm525_vm3 = vmand %vm323_vm15, %vm461_vm2  ;;  %vm455_vm15 = vcmp.lt.s32.totalorder %v416_v29, %v1400_v51 }
  0xe1   : > { %vm1000_vm12 = vmpackc.low %vm525_vm3, %vm523_vm4  ;;  %vm491_vm3 = vcmp.lt.s32.totalorder %v434_v30, %v1400_v51 }
  0xe2   : > { %vm1769_vm7 = vmand %vm320_vm13, %vm458_vm1  ;;  %1001 = vmatpush.bf16.msk.msra.mxu0 %vm1000_vm12, %v1235_v18  ;;  %vm355_vm1 = vcmp.eq.s32.totalorder %v278_v34, %v1398_v50  ;;  %vm456_vm12 = vcmp.lt.s32.totalorder %v416_v29, %v1405_v54 }
  0xe3   : > { %vm524_vm10 = vmand %vm322_vm5, %vm460_vm9  ;;  %vm493_vm5 = vcmp.lt.s32.totalorder %v435_v32, %v1400_v51  ;;  %v272_v42 = vpop.permute.xlu1 %271 }
  0xe4   : > { %vm526_vm2 = vmand %vm324_vm0, %vm462_vm11  ;;  %vm318_vm0 = vcmp.eq.s32.totalorder %v221_v31, %v1403_v53  ;;  %v269_v38 = vpop.permute.xlu0 %268 }
  0xe5   : > { %vm1032_vm4 = vmpackc.low %vm526_vm2, %vm524_vm10  ;;  %vm492_vm2 = vcmp.lt.s32.totalorder %v434_v30, %v1405_v54 }
  0xe6   : > { %1033 = vmatpush.bf16.msk.msra.mxu2 %vm1032_vm4, %v1235_v18  ;;  %vm519_vm13 = vmand %vm317_vm8, %vm455_vm15  ;;  %vm354_vm8 = vcmp.eq.s32.totalorder %v1706_v10, %v1403_v53 }
  0xe7   : > { %vm1002_vm9 = vmpackc.low %vm1751_vm6, %vm519_vm13  ;;  %vm356_vm6 = vcmp.eq.s32.totalorder %v278_v34, %v1403_v53  ;;  %vm494_vm13 = vcmp.lt.s32.totalorder %v435_v32, %v1405_v54 }
  0xe8   : > { %1003 = vmatpush.bf16.msk.msra.mxu0 %vm1002_vm9, %v1235_v18  ;;  %vm555_vm11 = vmand %vm353_vm14, %vm491_vm3 }
  0xe9   : > { %vm557_vm10 = vmand %vm355_vm1, %vm493_vm5  ;;  %vm487_vm1 = vcmp.lt.s32.totalorder %v432_v39, %v1400_v51  ;;  %vm349_vm5 = vcmp.eq.s32.totalorder %v269_v38, %v1398_v50 }
  0xea   : > { %vm1016_vm15 = vmpackc.low %vm557_vm10, %vm555_vm11  ;;  %vm350_vm11 = vcmp.eq.s32.totalorder %v269_v38, %v1403_v53  ;;  %vm489_vm10 = vcmp.lt.s32.totalorder %v433_v40, %v1400_v51 }
  0xeb   : > { %1017 = vmatpush.bf16.msk.msra.mxu1 %vm1016_vm15, %v1235_v18  ;;  %vm520_vm4 = vmand %vm318_vm0, %vm456_vm12  ;;  %752 = vmatmul.bf16.vlgmr.msra.gmra.mxu0 %v1236_v41  ;;  %vm488_vm0 = vcmp.lt.s32.totalorder %v432_v39, %v1405_v54  ;;  %vm351_vm15 = vcmp.eq.s32.totalorder %v272_v42, %v1398_v50 }
  0xec   : > { %vm1034_vm14 = vmpackc.low %vm1769_vm7, %vm520_vm4 }
  0xed   : > { %1035 = vmatpush.bf16.msk.msra.mxu2 %vm1034_vm14, %v1235_v18  ;;  %vm556_vm3 = vmand %vm354_vm8, %vm492_vm2  ;;  %vm490_vm8 = vcmp.lt.s32.totalorder %v433_v40, %v1405_v54  ;;  %vm352_vm2 = vcmp.eq.s32.totalorder %v272_v42, %v1403_v53 }
  0xee   : > { %vm558_vm9 = vmand %vm356_vm6, %vm494_vm13 }
  0xef   : > { %vm1048_vm12 = vmpackc.low %vm558_vm9, %vm556_vm3 }
  0xf0   : > { %1049 = vmatpush.bf16.msk.msra.mxu3 %vm1048_vm12, %v1235_v18  ;;  %778 = vmatmul.bf16.vlgmr.msra.gmra.mxu2 %v1236_v41  ;;  %vm551_vm7 = vmand %vm349_vm5, %vm487_vm1  ;;  %vm799_vm1 = vcmask 1040384   ;;  %vm805_vm5 = vcmp.lt.s32.totalorder %v382_v37, 256 }
  0xf1   : > { %vm552_vm4 = vmand %vm350_vm11, %vm488_vm0 }
  0xf2   : > { %vm553_vm14 = vmand %vm351_vm15, %vm489_vm10 }
  0xf3   : > { %vm554_vm6 = vmand %vm352_vm2, %vm490_vm8 }
  0xf4   : > { %vm1018_vm13 = vmpackc.low %vm553_vm14, %vm551_vm7 }
  0xf5   : > { %1019 = vmatpush.bf16.msk.msra.mxu1 %vm1018_vm13, %v1235_v18  ;;  %vm1050_vm3 = vmpackc.low %vm554_vm6, %vm552_vm4 }
  0xf6   : > { %1051 = vmatpush.bf16.msk.msra.mxu3 %vm1050_vm3, %v1235_v18 }
  0xf8   : > { %765 = vmatmul.bf16.vlgmr.msra.gmra.mxu1 %v1236_v41 }
  0xf9   : > { %791 = vmatmul.bf16.vlgmr.msra.gmra.mxu3 %v1236_v41 }
 0x168   : > { %v753_v44 = vpop.f32.mrf.mxu0 }
 0x170   : > { %v755_v50 = vpop.f32.mrf.mxu0 }
 0x173   : > { %v779_v51 = vpop.f32.mrf.mxu2 }
 0x175   : > { %v766_v43 = vpop.f32.mrf.mxu1 }
 0x176   : > { %v767_v53 = vadd.f32 %v766_v43, %v753_v44 }
 0x17b   : > { %v781_v45 = vpop.f32.mrf.mxu2 }
 0x17c   : > { %v792_v46 = vpop.f32.mrf.mxu3 }
 0x17d   : > { %v793_v54 = vadd.f32 %v792_v46, %v779_v51  ;;  %v768_v47 = vpop.f32.mrf.mxu1 }
 0x17f   : > { %v798_v49 = vrot.slane %v793_v54, 7 }
 0x180   : > { %811 = sbr.rel (%p1052_p1) target bundleno = 399 (0x18f), region = 36 }
 0x181   : > { %v800_v52 = vsel %vm799_vm1, %v767_v53, %v798_v49 }
 0x182   : > { %v802_v55 = vadd.f32 %v800_v52, %v583_v48 }
 0x184   : > { %807 = vst.msk [vmem:[#allocation2] sm:$0x3] %vm805_vm5, %v802_v55  ;;  %v794_v18 = vpop.f32.mrf.mxu3 }
 0x185   : > { %v1237_v57 = vmov 0.0  }
 0x18b   : > { %v812_v56 = vld [vmem:[#allocation2] sm:$0x3] }
 0x18c   : > { %vm813_vm9 = vcmp.lt.f32.partialorder %v812_v56, 0.5 }
 0x18d   : > { %v1053_v58 = vsel %vm813_vm9, 1.0, %v1237_v57 }
 0x18e   : > { %816 = vst.msk [vmem:[%s163_s18] sm:$0x3] %vm805_vm5, %v1053_v58 }
 0x18f PF: > { %s828_s4 = scalar_lea.hbm %s1863_s2, %s1324_s27  ;;  %s830_s5 = sshll.u32 %s163_s18, 4  ;;  %s831_s5 = int_to_ptr.vmem [resolvable:$true] %s830_s5 }
 0x190   : > { %s832_s12 = sshll.u32 %s828_s4, 4  ;;  %s818_s6 = scalar_lea.sflag [#allocation4], %s161_s26  ;;  %s833_s12 = int_to_ptr.hbm [resolvable:$true] %s832_s12 }
 0x191   : > { %s1151_s7 = sshra.s32 %s833_s12, 4  ;;  %s1157_s24 = scalar_lea.hbm %s1863_s2, 16  ;;  %s1152_s7 = int_to_ptr.hbm [resolvable:$true] %s1151_s7 }
 0x192   : > { %s1153_s8 = scalar_lea.hbm %s1152_s7, 2  ;;  %p1158_p6 = scmp.lt.s32.totalorder %s1152_s7, %s1863_s2 }
 0x193   : > { %p1154_p2 = scmp.ne.s32.totalorder %s1152_s7, %s1153_s8  ;;  %p1159_p7 = scmp.lt.s32.totalorder %s1157_s24, %s1153_s8 }
 0x195   : > { %p1155_p4 = pnand %p1154_p2, %p1302_p3  ;;  %p1160_p8 = por %p1159_p7, %p1158_p6 }
 0x197   : > { %p1156_p5 = pneg %p1155_p4 }
 0x199   : > { %p1161_p10 = pnand %p1160_p8, %p1156_p5 }
 0x19b   : > { %1164 = shalt.err (!%p1161_p10)
}
 0x19c   : > { %1058 = dma.vmem_to_hbm [thread:$0]  (%p1302_p3), %s831_s5, 32, %s833_s12, %s818_s6  }
 0x19d PF: > { %p1064_p11 = scmp.ge.s32.totalorder %s1231_s16, 2  ;;  %s844_s26 = sand.u32 1, %s1203_s9  }
 0x19e   : > { %s845_s28 = scalar_lea.sflag [#allocation4], %s844_s26 }
 0x19f   : > { %p1061_p12 = pnand %p1064_p11, %p1312_p9 }
 0x1a1   : > { %p1062_p13 = pneg %p1061_p12 }
 0x1a3   : > { %1198 = dma.done.wait (%p1062_p13), %s845_s28, 32  }
 0x1a4   : > { %1200 = vsyncadd (%p1062_p13), %s845_s28, 4294967264  ;;  %s15_s16 = sadd.s32 1, %s1231_s16   ;;  %s1915_s9 = smov %s1207_s10 }
 0x1a5   : > { %p12_p0 = scmp.ge.s32.totalorder %s15_s16, 66   ;;  %s1916_s10 = smov %s1211_s11 }
 0x1a6   : > { %s1917_s11 = smov %s1320_s25  ;;  %s1918_s12 = smov %s1223_s14 }
 0x1a7   : > { %s1919_s13 = smov %s1227_s15  ;;  %s1920_s14 = smov %s1923_s19 }
 0x1a8   : > { %s1921_s15 = smov %s1927_s20  ;;  %14 = sbr.rel (!%p12_p0) target bundleno = 5 (0x5), region = 74 }
 0x1ad   :  { %851 = vsyncpa [#allocation4], 1 }
 0x1ae   :  { %853 = vsyncpa [#allocation4 + $0x1], 1 }

</bundles_post_ra>
